<compile_context>
chip_gen: v7x
topology: tpu7x:2x2x1
jax: 0.10.0
libtpu: 0.0.40
codegen_flags: <defaults>
</compile_context>

<pallas_src>
import functools

import jax
import jax.numpy as jnp
from jax.experimental import pallas as pl
from jax.experimental.pallas import tpu as pltpu

ALPHA = 0.35
GAMMA = 2.0
NEG_WEIGHT = 5.0
EPS = 1e-8
LANE = 128
_SUB = 32   # sublane multiple that is safe for f32 / bf16 / int8 / bool streams


def _focal_loss_kernel(logits_ref, targets_ref, *rest, alpha, gamma, neg_weight,
                       n_elem, has_mask, needs_tail):
    if has_mask:
        mask_ref, partial_ref = rest
    else:
        (partial_ref,) = rest

    # Inputs are streamed in caller-native dtype; cast to f32 in-register only.
    x = logits_ref[...].astype(jnp.float32)
    t = targets_ref[...].astype(jnp.float32)   # binary {0,1} labels

    # Fused, numerically-stable BCE-with-logits + (1 - pt), exact for binary targets:
    #   z      = (2t - 1) * x
    #   bce    = -log(sigmoid(z)) = softplus(-z) = max(-z, 0) + log1p(exp(-|z|))
    #   1 - pt = 1 - sigmoid(z)   = where(z >= 0, e, 1) / (1 + e),   e = exp(-|z|)
    # Only two EUP transcendentals (exp, log1p) per element.
    z = (2.0 * t - 1.0) * x
    e = jnp.exp(-jnp.abs(z))
    bce = jnp.maximum(-z, 0.0) + jnp.log1p(e)
    one_m_pt = jnp.where(z >= 0.0, e, 1.0) / (1.0 + e)

    if gamma == 2.0:                 # avoid pow -> exp(gamma*log(.)) on the EUP
        focal_w = one_m_pt * one_m_pt
    elif gamma == 1.0:
        focal_w = one_m_pt
    else:
        focal_w = jnp.where(one_m_pt > 0.0, one_m_pt ** gamma, 0.0)

    alpha_w = jnp.where(t == 0.0, alpha * neg_weight, 1.0 - alpha)
    loss = alpha_w * focal_w * bce

    if needs_tail:
        # Ragged tail: the last grid block (and/or the lane padding of the last
        # row) extends past the real data. Mask by global element index instead
        # of padding whole arrays in the wrapper.
        shp = x.shape
        row_ids = pl.program_id(0) * shp[0] + jax.lax.broadcasted_iota(jnp.int32, shp, 0)
        col_ids = jax.lax.broadcasted_iota(jnp.int32, shp, 1)
        valid = (row_ids * LANE + col_ids) < n_elem

    if has_mask:
        m = mask_ref[...].astype(jnp.float32)
        if needs_tail:
            m = jnp.where(valid, m, 0.0)
        loss = loss * m

    if needs_tail:
        # Select (not multiply) so garbage/NaN reads in the out-of-bounds tail
        # never reach the sum.
        loss = jnp.where(valid, loss, 0.0)

    # Lane-wise partial sums (sublane-direction reduce only); a single store per
    # block. Cross-lane / cross-block reduction happens once in the wrapper.
    loss_row = jnp.sum(loss, axis=0, keepdims=True)              # (1, LANE)
    if has_mask:
        mask_row = jnp.sum(m, axis=0, keepdims=True)             # (1, LANE)
        partial_ref[0, :, :] = jnp.concatenate([loss_row, mask_row], axis=0)
    else:
        partial_ref[0, :, :] = loss_row


def binary_focal_loss_with_mask(logits, targets, attention_mask=None, *,
                                alpha=ALPHA, gamma=GAMMA, neg_weight=NEG_WEIGHT,
                                reduction="mean", tile_rows=4096):
    """Binary focal loss with optional attention mask ('mean' or 'sum').

    Accepts arbitrary (matching) input shapes in their caller-native dtypes;
    internally flattens to a (rows, 128) lane grid. Only a <=127-element pad is
    ever materialized; ragged grid tails are masked inside the kernel.
    With attention_mask=None, 'mean' divides by the element count.
    """
    assert targets.shape == logits.shape
    has_mask = attention_mask is not None
    if has_mask:
        assert attention_mask.shape == logits.shape
    if reduction not in ("mean", "sum"):
        # TODO(synk): reduction='none' (per-element loss output) not implemented.
        raise NotImplementedError("only reduction='mean' or 'sum' supported")

    n_elem = int(logits.size)

    # Caller-native dtypes preserved; casting happens in-register inside the kernel.
    arrays = [logits.reshape(-1), targets.reshape(-1)]
    if has_mask:
        arrays.append(attention_mask.reshape(-1))

    rows = pl.cdiv(n_elem, LANE)
    lane_pad = rows * LANE - n_elem
    if lane_pad:
        # <=127 elements; needed only so the flat array reshapes to (rows, 128).
        arrays = [jnp.pad(a, (0, lane_pad)) for a in arrays]
    arrays = [a.reshape(rows, LANE) for a in arrays]

    # Tile height: large blocks amortize pipeline overhead; keep >=2 blocks for
    # non-tiny inputs so both v7x TensorCores get work on the 'parallel' axis.
    if rows < 2 * _SUB:
        tr = rows                                   # tiny input: one full-height block
    else:
        tr = min(int(tile_rows), rows // 2)         # guarantee >= 2 grid blocks
        tr = max(_SUB, (tr // _SUB) * _SUB)         # sublane-packing safe for all dtypes
    num_blocks = pl.cdiv(rows, tr)
    needs_tail = (num_blocks * tr * LANE) != n_elem
    out_rows = 2 if has_mask else 1

    kernel = functools.partial(
        _focal_loss_kernel, alpha=float(alpha), gamma=float(gamma),
        neg_weight=float(neg_weight), n_elem=n_elem,
        has_mask=has_mask, needs_tail=needs_tail)

    in_blk = pl.BlockSpec((tr, LANE), lambda i: (i, 0))

    in_bytes = sum(int(a.size) * int(a.dtype.itemsize) for a in arrays)
    out_bytes = num_blocks * out_rows * LANE * 4
    cost = pl.CostEstimate(flops=15 * n_elem, transcendentals=2 * n_elem,
                           bytes_accessed=int(in_bytes + out_bytes))

    # Double-buffered input blocks + headroom; explicit limit keeps big tiles
    # legal on v5e (16 MiB default scoped VMEM) and safe under v7x's 64 MiB.
    vmem_block_bytes = sum(2 * tr * LANE * int(a.dtype.itemsize) for a in arrays)
    vmem_limit = int(min(max(vmem_block_bytes + (4 << 20), 32 << 20), 56 << 20))

    partials = pl.pallas_call(
        kernel,
        out_shape=jax.ShapeDtypeStruct((num_blocks, out_rows, LANE), jnp.float32),
        grid_spec=pltpu.PrefetchScalarGridSpec(
            num_scalar_prefetch=0,
            grid=(num_blocks,),
            in_specs=[in_blk] * len(arrays),
            out_specs=pl.BlockSpec((1, out_rows, LANE), lambda i: (i, 0, 0)),
        ),
        compiler_params=pltpu.CompilerParams(
            dimension_semantics=("parallel",),
            vmem_limit_bytes=vmem_limit),
        cost_estimate=cost,
    )(*arrays)

    loss_sum = jnp.sum(partials[:, 0, :])
    if reduction == "sum":
        return loss_sum
    if has_mask:
        mask_sum = jnp.sum(partials[:, 1, :])
    else:
        mask_sum = jnp.float32(n_elem)
    return loss_sum / (mask_sum + EPS)


def _reference(logits, targets, mask=None, alpha=ALPHA, gamma=GAMMA,
               neg_weight=NEG_WEIGHT, reduction="mean"):
    # Literal transcription of the PyTorch module.
    x = logits.astype(jnp.float32)
    t = targets.astype(jnp.float32)
    bce = jnp.maximum(x, 0.0) - x * t + jnp.log1p(jnp.exp(-jnp.abs(x)))
    probs = jax.nn.sigmoid(x)
    pt = jnp.where(t == 1.0, probs, 1.0 - probs)
    focal_w = (1.0 - pt) ** gamma
    alpha_w = jnp.where(t == 0.0, alpha * neg_weight, 1.0 - alpha)
    loss = alpha_w * focal_w * bce
    m = jnp.ones_like(x) if mask is None else mask.astype(jnp.float32)
    loss = loss * m
    if reduction == "mean":
        return loss.sum() / (m.sum() + EPS)
    return loss.sum()


if __name__ == "__main__":
    key = jax.random.PRNGKey(0)
    k1, k2, k3 = jax.random.split(key, 3)

    # Small (batch, seq) discriminator token grid; wrapper flattens internally.
    batch, seq = 2, 384
    logits = jax.random.normal(k1, (batch, seq), dtype=jnp.float32) * 2.0
    targets = (jax.random.uniform(k2, (batch, seq)) > 0.5).astype(jnp.float32)
    attention_mask = (jax.random.uniform(k3, (batch, seq)) > 0.2).astype(jnp.float32)

    # 1) masked mean, lane-aligned size.
    loss = jax.block_until_ready(
        binary_focal_loss_with_mask(logits, targets, attention_mask))
    ref = _reference(logits, targets, attention_mask)
    assert jnp.allclose(loss, ref, rtol=1e-5, atol=1e-6), (loss, ref)

    # 2) masked mean, non-lane-aligned size (exercises in-kernel tail masking).
    l2, t2, m2 = logits[:, :383], targets[:, :383], attention_mask[:, :383]
    loss2 = jax.block_until_ready(binary_focal_loss_with_mask(l2, t2, m2))
    ref2 = _reference(l2, t2, m2)
    assert jnp.allclose(loss2, ref2, rtol=1e-5, atol=1e-6), (loss2, ref2)

    # 3) no mask, reduction='sum' (mask stream skipped entirely).
    loss3 = jax.block_until_ready(
        binary_focal_loss_with_mask(logits, targets, None, reduction="sum"))
    ref3 = _reference(logits, targets, None, reduction="sum")
    assert jnp.allclose(loss3, ref3, rtol=1e-5, atol=1e-6), (loss3, ref3)

    print("KERNEL_OK")
</pallas_src>

<mosaic_0001>
module attributes {stable_mosaic.version = 11 : i64} {
  func.func @_focal_loss_kernel(%arg0: i32, %arg1: memref<6x128xf32, #tpu.memory_space<vmem>>, %arg2: memref<6x128xf32, #tpu.memory_space<vmem>>, %arg3: memref<6x128xf32, #tpu.memory_space<vmem>>, %arg4: memref<1x2x128xf32, #tpu.memory_space<vmem>>) attributes {dimension_semantics = [#tpu.dimension_semantics<parallel>], iteration_bounds = array<i64: 1>, scalar_prefetch = 0 : i64, scratch_operands = 0 : i64, tpu.core_type = #tpu.core_type<tc>, window_params = [{transform_indices = @transform_0, window_bounds = array<i64: 6, 128>}, {transform_indices = @transform_1, window_bounds = array<i64: 6, 128>}, {transform_indices = @transform_2, window_bounds = array<i64: 6, 128>}, {transform_indices = @transform_3, window_bounds = array<i64: 1, 2, 128>}]} {
    %c0 = arith.constant 0 : index
    %c0_0 = arith.constant 0 : index
    %0 = vector.load %arg1[%c0, %c0_0] : memref<6x128xf32, #tpu.memory_space<vmem>>, vector<6x128xf32>
    %c0_1 = arith.constant 0 : index
    %c0_2 = arith.constant 0 : index
    %1 = vector.load %arg2[%c0_1, %c0_2] : memref<6x128xf32, #tpu.memory_space<vmem>>, vector<6x128xf32>
    %cst = arith.constant 2.000000e+00 : f32
    %2 = vector.broadcast %cst : f32 to vector<6x128xf32>
    %3 = arith.mulf %2, %1 : vector<6x128xf32>
    %cst_3 = arith.constant 1.000000e+00 : f32
    %4 = vector.broadcast %cst_3 : f32 to vector<6x128xf32>
    %5 = arith.subf %3, %4 : vector<6x128xf32>
    %6 = arith.mulf %5, %0 : vector<6x128xf32>
    %7 = math.absf %6 : vector<6x128xf32>
    %cst_4 = arith.constant 0.000000e+00 : f32
    %8 = vector.broadcast %cst_4 : f32 to vector<6x128xf32>
    %9 = arith.subf %8, %7 : vector<6x128xf32>
    %10 = math.exp %9 : vector<6x128xf32>
    %cst_5 = arith.constant 0.000000e+00 : f32
    %11 = vector.broadcast %cst_5 : f32 to vector<6x128xf32>
    %12 = arith.subf %11, %6 : vector<6x128xf32>
    %cst_6 = arith.constant 0.000000e+00 : f32
    %13 = vector.broadcast %cst_6 : f32 to vector<6x128xf32>
    %14 = arith.maximumf %12, %13 : vector<6x128xf32>
    %15 = math.log1p %10 : vector<6x128xf32>
    %16 = arith.addf %14, %15 : vector<6x128xf32>
    %cst_7 = arith.constant 0.000000e+00 : f32
    %17 = vector.broadcast %cst_7 : f32 to vector<6x128xf32>
    %18 = arith.cmpf oge, %6, %17 : vector<6x128xf32>
    %cst_8 = arith.constant 1.000000e+00 : f32
    %19 = vector.broadcast %cst_8 : f32 to vector<6x128xf32>
    %20 = arith.select %18, %10, %19 : vector<6x128xi1>, vector<6x128xf32>
    %cst_9 = arith.constant 1.000000e+00 : f32
    %21 = vector.broadcast %cst_9 : f32 to vector<6x128xf32>
    %22 = arith.addf %21, %10 : vector<6x128xf32>
    %23 = arith.divf %20, %22 : vector<6x128xf32>
    %24 = arith.mulf %23, %23 : vector<6x128xf32>
    %cst_10 = arith.constant 0.000000e+00 : f32
    %25 = vector.broadcast %cst_10 : f32 to vector<6x128xf32>
    %26 = arith.cmpf oeq, %1, %25 : vector<6x128xf32>
    %cst_11 = arith.constant 1.750000e+00 : f32
    %cst_12 = arith.constant 6.500000e-01 : f32
    %27 = vector.broadcast %cst_11 : f32 to vector<6x128xf32>
    %28 = vector.broadcast %cst_12 : f32 to vector<6x128xf32>
    %29 = arith.select %26, %27, %28 : vector<6x128xi1>, vector<6x128xf32>
    %30 = arith.mulf %29, %24 : vector<6x128xf32>
    %31 = arith.mulf %30, %16 : vector<6x128xf32>
    %c0_13 = arith.constant 0 : index
    %c0_14 = arith.constant 0 : index
    %32 = vector.load %arg3[%c0_13, %c0_14] : memref<6x128xf32, #tpu.memory_space<vmem>>, vector<6x128xf32>
    %33 = arith.mulf %31, %32 : vector<6x128xf32>
    %cst_15 = arith.constant dense<0.000000e+00> : vector<128xf32>
    %34 = vector.multi_reduction <add>, %33, %cst_15 [0] : vector<6x128xf32> to vector<128xf32>
    %35 = vector.shape_cast %34 : vector<128xf32> to vector<1x128xf32>
    %cst_16 = arith.constant dense<0.000000e+00> : vector<128xf32>
    %36 = vector.multi_reduction <add>, %32, %cst_16 [0] : vector<6x128xf32> to vector<128xf32>
    %37 = vector.shape_cast %36 : vector<128xf32> to vector<1x128xf32>
    %38 = tpu.concatenate %35, %37 in 0 : vector<1x128xf32>, vector<1x128xf32> -> vector<2x128xf32>
    %c0_17 = arith.constant 0 : index
    %c0_18 = arith.constant 0 : index
    %c0_19 = arith.constant 0 : index
    %39 = vector.load %arg4[%c0_17, %c0_18, %c0_19] : memref<1x2x128xf32, #tpu.memory_space<vmem>>, vector<1x2x128xf32>
    %40 = vector.shape_cast %39 : vector<1x2x128xf32> to vector<2x128xf32>
    %41 = vector.shape_cast %38 : vector<2x128xf32> to vector<1x2x128xf32>
    tpu.vector_store %arg4[%c0_17, %c0_18, %c0_19], %41 {strides = array<i32>} : memref<1x2x128xf32, #tpu.memory_space<vmem>>, vector<1x2x128xf32>,
    return
  }
  func.func @transform_0(%arg0: i32) -> (i32, i32) {
    %c0_i32 = arith.constant 0 : i32
    %c0_i32_0 = arith.constant 0 : i32
    return %arg0, %c0_i32 : i32, i32
  }
  func.func @transform_1(%arg0: i32) -> (i32, i32) {
    %c0_i32 = arith.constant 0 : i32
    %c0_i32_0 = arith.constant 0 : i32
    return %arg0, %c0_i32 : i32, i32
  }
  func.func @transform_2(%arg0: i32) -> (i32, i32) {
    %c0_i32 = arith.constant 0 : i32
    %c0_i32_0 = arith.constant 0 : i32
    return %arg0, %c0_i32 : i32, i32
  }
  func.func @transform_3(%arg0: i32) -> (i32, i32, i32) {
    %c0_i32 = arith.constant 0 : i32
    %c0_i32_0 = arith.constant 0 : i32
    %c0_i32_1 = arith.constant 0 : i32
    return %arg0, %c0_i32, %c0_i32_0 : i32, i32, i32
  }
}

</mosaic_0001>

<bundles_post_ra>
// kernel: tpu_custom_call.1
= control target key start
LH: loop header
LB: loop body
LE: loop exit
PB: predicated region body
PF: predicated region fallthrough
CT: control target
= control target key end

     0   :  { %8 = vsyncpa [#allocation3], 0  ;;  %s298_s0 = inlined_call_operand.hbm [shape: f32[6,128], index: 0, kind: input, shape index: {}]   ;;  %s299_s1 = inlined_call_operand.hbm [shape: f32[6,128], index: 1, kind: input, shape index: {}]   ;;  %s300_s2 = inlined_call_operand.hbm [shape: f32[6,128], index: 2, kind: input, shape index: {}]   ;;  %s301_s3 = inlined_call_operand.hbm [shape: f32[1,2,128], index: 3, kind: output, shape index: {}]  }
   0x1   :  { %9 = vsyncpa [#allocation6], 0 }
   0x2   :  { %10 = vsyncpa [#allocation4], 0  ;;  %s223_s12 = smov [#allocation5]   ;;  %s224_s14 = smov [#allocation2]  }
   0x3   :  { %s27_s13 = sshll.u32 %s223_s12, 4  ;;  %s17_s15 = sshll.u32 %s224_s14, 4  ;;  %s28_s13 = int_to_ptr.vmem [resolvable:$true] %s27_s13  ;;  %s18_s15 = int_to_ptr.vmem [resolvable:$true] %s17_s15 }
   0x4   :  { %s129_s18 = scalar_lea.hbm %s299_s1, 128 }
   0x5   :  { %p130_p0 = scmp.ne.s32.totalorder %s299_s1, %s129_s18  ;;  %p133_p1 = scmp.lt.u32.totalorder %s129_s18, %s299_s1 }
   0x7   :  { %p135_p2 = pnand %p133_p1, %p130_p0 }
   0x9   :  { %138 = shalt.err (!%p135_p2)
}
   0xa   :  { %s139_s23 = scalar_lea.vmem %s28_s13, 128  ;;  %p144_p4 = scmp.lt.s32.totalorder %s28_s13, %s28_s13 }
   0xb   :  { %p140_p3 = scmp.ne.s32.totalorder %s28_s13, %s139_s23  ;;  %p145_p5 = scmp.lt.s32.totalorder %s139_s23, %s139_s23 }
   0xd   :  { %p146_p6 = por %p145_p5, %p144_p4 }
   0xf   :  { %p147_p7 = pnand %p146_p6, %p140_p3 }
  0x11   :  { %150 = shalt.err (!%p147_p7)
}
  0x12   :  { %30 = dma.hbm_to_vmem [thread:$0]  %s299_s1, 128, %s28_s13, [#allocation6]  }
  0x13   :  { %s151_s28 = scalar_lea.hbm %s298_s0, 128 }
  0x14   :  { %p152_p8 = scmp.ne.s32.totalorder %s298_s0, %s151_s28  ;;  %p155_p9 = scmp.lt.u32.totalorder %s151_s28, %s298_s0 }
  0x16   :  { %p157_p10 = pnand %p155_p9, %p152_p8 }
  0x18   :  { %160 = shalt.err (!%p157_p10)
}
  0x19   :  { %s161_s6 = scalar_lea.vmem %s18_s15, 128  ;;  %p166_p12 = scmp.lt.s32.totalorder %s18_s15, %s18_s15 }
  0x1a   :  { %p162_p11 = scmp.ne.s32.totalorder %s18_s15, %s161_s6  ;;  %p167_p13 = scmp.lt.s32.totalorder %s161_s6, %s161_s6 }
  0x1c   :  { %p168_p0 = por %p167_p13, %p166_p12 }
  0x1e   :  { %p169_p1 = pnand %p168_p0, %p162_p11 }
  0x20   :  { %172 = shalt.err (!%p169_p1)
}
  0x21   :  { %20 = dma.hbm_to_vmem [thread:$0]  %s298_s0, 128, %s18_s15, [#allocation3]  }
  0x22   :  { %s225_s8 = smov [#allocation7]   ;;  %s173_s12 = scalar_lea.hbm %s300_s2, 128 }
  0x23   :  { %s37_s9 = sshll.u32 %s225_s8, 4  ;;  %p174_p2 = scmp.ne.s32.totalorder %s300_s2, %s173_s12  ;;  %s38_s9 = int_to_ptr.vmem [resolvable:$true] %s37_s9 }
  0x24   :  { %p177_p3 = scmp.lt.u32.totalorder %s173_s12, %s300_s2 }
  0x26   :  { %p179_p4 = pnand %p177_p3, %p174_p2 }
  0x28   :  { %182 = shalt.err (!%p179_p4)
}
  0x29   :  { %s183_s18 = scalar_lea.vmem %s38_s9, 128  ;;  %p188_p6 = scmp.lt.s32.totalorder %s38_s9, %s38_s9 }
  0x2a   :  { %p184_p5 = scmp.ne.s32.totalorder %s38_s9, %s183_s18  ;;  %p189_p7 = scmp.lt.s32.totalorder %s183_s18, %s183_s18 }
  0x2c   :  { %p190_p8 = por %p189_p7, %p188_p6 }
  0x2e   :  { %p191_p9 = pnand %p190_p8, %p184_p5 }
  0x30   :  { %194 = shalt.err (!%p191_p9)
}
  0x31   :  { %40 = dma.hbm_to_vmem [thread:$0]  %s300_s2, 128, %s38_s9, [#allocation6]  }
  0x32   :  { %217 = dma.done.wait [#allocation3], 128  }
  0x33   :  { %218 = vsyncadd [#allocation3], 4294967168 }
  0x34   :  { %219 = dma.done.wait [#allocation6], 256  }
  0x35   :  { %220 = vsyncadd [#allocation6], 4294967040  ;;  %v51_v0 = vld [vmem:[#allocation5] sm:$0x3f]  ;;  %v50_v2 = vld [vmem:[#allocation2] sm:$0x3f] }
  0x36   :  { %v52_v1 = vmul.f32 2.0, %v51_v0  ;;  %vm83_vm0 = vcmask 1045504   ;;  %v81_v14 = vld [vmem:[#allocation7] sm:$0x3f]  ;;  %vm77_vm3 = vcmp.eq.f32.partialorder %v51_v0, 0.0  ;;  %s227_s2 = smov [#allocation8]  }
  0x37   :  { %v91_v15 = vsel %vm83_vm0, %v81_v14, 0.0  ;;  %v226_v25 = vmov 0.65   ;;  %s107_s19 = sshll.u32 %s227_s2, 4  ;;  %vm98_vm4 = vcmask 1040384   ;;  %s108_s19 = int_to_ptr.vmem [resolvable:$true] %s107_s19 }
  0x38   :  { %v117_v3 = vadd.f32 -1.0, %v52_v1  ;;  %v92_v22 = vrot.slane %v91_v15, 4  ;;  %v78_v26 = vsel %vm77_vm3, 1.75, %v226_v25  ;;  %s195_s20 = scalar_lea.vmem %s108_s19, 32  ;;  %p200_p11 = scmp.lt.s32.totalorder %s108_s19, %s108_s19 }
  0x39   :  { %p196_p10 = scmp.ne.s32.totalorder %s108_s19, %s195_s20  ;;  %p201_p12 = scmp.lt.s32.totalorder %s195_s20, %s195_s20 }
  0x3a   :  { %v54_v4 = vmul.f32 %v117_v3, %v50_v2  ;;  %v93_v29 = vadd.f32 %v92_v22, %v91_v15 }
  0x3b   :  { %p202_p13 = por %p201_p12, %p200_p11 }
  0x3c   :  { %v55_v5 = vand.u32 2147483647, %v54_v4  ;;  %v59_v12 = vsub.f32 0.0, %v54_v4  ;;  %vm71_vm1 = vcmp.ge.f32.partialorder %v54_v4, 0.0  ;;  %v94_v32 = vrot.slane %v93_v29, 2 }
  0x3d   :  { %p203_p0 = pnand %p202_p13, %p196_p10 }
  0x3e   :  { %v56_v6 = vsub.f32 0.0, %v55_v5  ;;  %v60_v19 = vmax.f32 %v59_v12, 0.0  ;;  %v95_v36 = vadd.f32 %v94_v32, %v93_v29 }
  0x40   :  { %v57_v7 = vmul.f32 1.442695, %v56_v6  ;;  %v96_v39 = vrot.slane %v95_v36, 1 }
  0x42   :  { %123 = vpow2.f32 %v57_v7  ;;  %v97_v42 = vadd.f32 %v96_v39, %v95_v36 }
  0x4c   :  { %v124_v8 = vpop.eup %123 }
  0x4d   :  { %v61_v9 = vadd.f32 1.0, %v124_v8  ;;  %v64_v10 = vmul.f32 -0.5, %v124_v8  ;;  %v67_v13 = vand.u32 2147483647, %v124_v8  ;;  %v72_v17 = vsel %vm71_vm1, %v124_v8, 1.0 }
  0x4f   :  { %125 = vlog2.f32 %v61_v9  ;;  %v65_v11 = vadd.f32 1.0, %v64_v10  ;;  %vm68_vm2 = vcmp.lt.f32.partialorder %v67_v13, 0.0004427343 }
  0x50   :  { %127 = vrcp.f32 %v61_v9 }
  0x51   :  { %v66_v16 = vmul.f32 %v124_v8, %v65_v11 }
  0x59   :  { %v126_v18 = vpop.eup %125 }
  0x5a   :  { %v128_v20 = vpop.eup %127  ;;  %v63_v21 = vmul.f32 0.6931472, %v126_v18 }
  0x5b   :  { %v75_v23 = vmul.f32 %v128_v20, %v72_v17 }
  0x5c   :  { %v69_v24 = vsel %vm68_vm2, %v66_v16, %v63_v21 }
  0x5d   :  { %v70_v27 = vadd.f32 %v69_v24, %v60_v19  ;;  %v76_v28 = vmul.f32 %v75_v23, %v75_v23 }
  0x5f   :  { %v79_v30 = vmul.f32 %v78_v26, %v76_v28 }
  0x61   :  { %v80_v31 = vmul.f32 %v79_v30, %v70_v27 }
  0x63   :  { %v82_v33 = vmul.f32 %v81_v14, %v80_v31 }
  0x65   :  { %v84_v34 = vsel %vm83_vm0, %v82_v33, 0.0 }
  0x66   :  { %v85_v35 = vrot.slane %v84_v34, 4 }
  0x68   :  { %v86_v37 = vadd.f32 %v85_v35, %v84_v34 }
  0x6a   :  { %v87_v38 = vrot.slane %v86_v37, 2 }
  0x6c   :  { %v88_v40 = vadd.f32 %v87_v38, %v86_v37 }
  0x6e   :  { %v89_v41 = vrot.slane %v88_v40, 1 }
  0x70   :  { %v90_v43 = vadd.f32 %v89_v41, %v88_v40 }
  0x72   :  { %v99_v44 = vsel %vm98_vm4, %v90_v43, %v97_v42 }
  0x73   :  { %100 = vst [vmem:[#allocation8] sm:$0x3] %v99_v44 }
  0x74   :  { %206 = shalt.err (!%p203_p0)
}
  0x75   :  { %s207_s23 = scalar_lea.hbm %s301_s3, 32 }
  0x76   :  { %p208_p1 = scmp.ne.s32.totalorder %s301_s3, %s207_s23  ;;  %p211_p2 = scmp.lt.u32.totalorder %s207_s23, %s301_s3 }
  0x78   :  { %p213_p3 = pnand %p211_p2, %p208_p1 }
  0x7a   :  { %216 = shalt.err (!%p213_p3)
}
  0x7b   :  { %110 = dma.vmem_to_hbm [thread:$0]  %s108_s19, 32, %s301_s3, [#allocation4]  }
  0x7c   :  { %221 = dma.done.wait [#allocation4], 32  }
  0x7d   :  { %222 = vsyncadd [#allocation4], 4294967264 }
  0x7e   :  { %114 = vsyncpa [#allocation3], 1 }
  0x7f   :  { %115 = vsyncpa [#allocation6], 1 }
  0x80   :  { %116 = vsyncpa [#allocation4], 1 }

</bundles_post_ra>
